<compile_context>
chip_gen: v6e
topology: v6e:2x2x1
jax: 0.10.0
libtpu: 0.0.40
codegen_flags: <defaults>
</compile_context>

<pallas_src>
from functools import partial

import jax
import jax.numpy as jnp
from jax.experimental import pallas as pl
from jax.experimental.pallas import tpu as pltpu

KH, KW = 7, 2        # Conv2d kernel_size=(7, 2)
FC_OUT = 30          # LazyLinear(30)


# ----------------------------------------------------------------------------- kernel


def _fused_kernel(x_ref, a_ref, b_ref, o_ref):
    # x_ref: (bt, H*W)        input tile (f32 or bf16)
    # a_ref: (H*W, Ho*30)     fused conv+fc weight (compute dtype, resident)
    # b_ref: (1,   Ho*30)     fused bias (f32, resident)
    # o_ref: (bt,  Ho*30)     output tile (un-padded lanes)
    x = x_ref[...].astype(a_ref.dtype)                       # bf16 MXU even for f32 inputs
    y = jnp.dot(x, a_ref[...], preferred_element_type=jnp.float32)
    o_ref[...] = jax.nn.sigmoid(y + b_ref[...]).astype(o_ref.dtype)


# ----------------------------------------------------------------------------- host-side weight fusion (run once per parameter set)


def fuse_params(params, H, W, compute_dtype=jnp.bfloat16):
    """Fold conv(7,2)+bias and Linear(Wo->30)+bias into A:(H*W, Ho*30), b:(1, Ho*30)."""
    Ho, Wo = H - KH + 1, W - KW + 1
    wconv = params["wconv"].reshape(KH, KW).astype(jnp.float32)   # (7, 2)
    bconv = params["bconv"].reshape(()).astype(jnp.float32)       # scalar
    wfc = params["wfc"].astype(jnp.float32)                       # (30, Wo)
    bfc = params["bfc"].astype(jnp.float32)                       # (30,)

    V = wfc.T                                                     # (Wo, 30)
    # Width-fused weight per kh:  Wk[kh, j, o] = sum_kw wconv[kh, kw] * V[j - kw, o]
    Wk = jnp.zeros((KH, W, FC_OUT), jnp.float32)
    for kw in range(KW):
        Vp = jnp.pad(V, ((kw, KW - 1 - kw), (0, 0)))              # (W, 30)
        Wk = Wk + wconv[:, kw][:, None, None] * Vp[None, :, :]

    # Place Wk on the (input-row, output-row) diagonals: A[i, j, r, o] = Wk[i - r, j, o]
    i_idx = jnp.arange(H)[:, None, None]
    r_idx = jnp.arange(Ho)[None, :, None]
    kh_idx = jnp.arange(KH)[None, None, :]
    sel = (i_idx == r_idx + kh_idx).astype(jnp.float32)           # (H, Ho, KH)
    A = jnp.einsum("irk,kjo->ijro", sel, Wk)                      # (H, W, Ho, 30)
    A = A.reshape(H * W, Ho * FC_OUT)

    b_row = bconv * jnp.sum(V, axis=0) + bfc                      # (30,)
    b_eff = jnp.broadcast_to(b_row[None, :], (Ho, FC_OUT)).reshape(1, Ho * FC_OUT)
    return A.astype(compute_dtype), b_eff.astype(jnp.float32)


# ----------------------------------------------------------------------------- wrapper


@partial(jax.jit, static_argnames=("b_tile", "out_dtype"))
def neural_network_forward(x, a_fused, b_fused, *, b_tile=1024, out_dtype=jnp.float32):
    """x: (N, 1, H, W) -> (N, 1, H-6, 30).  a_fused/b_fused from fuse_params()."""
    N, C, H, W = x.shape
    assert C == 1, "module hardcodes in_channels=1"
    Ho = H - KH + 1
    out_cols = Ho * FC_OUT
    k_dim = H * W
    assert a_fused.shape == (k_dim, out_cols), (a_fused.shape, (k_dim, out_cols))
    assert b_fused.shape == (1, out_cols)

    x2 = x.reshape(N, k_dim)                 # contiguous reshape: no HBM copy under jit
    bt = N if N <= b_tile else b_tile        # small batch -> one full-array block
    grid = (pl.cdiv(N, bt),)                 # ragged tail handled by Pallas boundary blocks

    out = pl.pallas_call(
        _fused_kernel,
        out_shape=jax.ShapeDtypeStruct((N, out_cols), out_dtype),
        grid=grid,
        in_specs=[
            pl.BlockSpec((bt, k_dim), lambda n: (n, 0)),        # batch tile of inputs
            pl.BlockSpec((k_dim, out_cols), lambda n: (0, 0)),  # fused weight (resident)
            pl.BlockSpec((1, out_cols), lambda n: (0, 0)),      # fused bias (resident)
        ],
        out_specs=pl.BlockSpec((bt, out_cols), lambda n: (n, 0)),
        compiler_params=pltpu.CompilerParams(
            dimension_semantics=("parallel",),                  # megacore / v7x 2-TC sharding
        ),
    )(x2, a_fused, b_fused)

    # Contiguous reshape (bitcast) back to the PyTorch layout; no slicing pass.
    return out.reshape(N, 1, Ho, FC_OUT)


# ----------------------------------------------------------------------------- params / reference


def init_params(key, w_in):
    """Deterministic PyTorch-style uniform init. w_in = W - 1 (LazyLinear in_features)."""
    k1, k2, k3, k4 = jax.random.split(key, 4)
    conv_bound = 1.0 / jnp.sqrt(1.0 * KH * KW)
    fc_bound = 1.0 / jnp.sqrt(float(w_in))
    return {
        "wconv": jax.random.uniform(k1, (1, 1, KH, KW), jnp.float32, -conv_bound, conv_bound),
        "bconv": jax.random.uniform(k2, (1,), jnp.float32, -conv_bound, conv_bound),
        "wfc": jax.random.uniform(k3, (FC_OUT, w_in), jnp.float32, -fc_bound, fc_bound),
        "bfc": jax.random.uniform(k4, (FC_OUT,), jnp.float32, -fc_bound, fc_bound),
    }


def reference_forward(x, params):
    """Pure-JAX reference matching PyTorch semantics (un-fused, f32)."""
    conv = jax.lax.conv_general_dilated(
        x, params["wconv"], window_strides=(1, 1), padding="VALID",
        dimension_numbers=("NCHW", "OIHW", "NCHW"))
    conv = conv + params["bconv"].reshape(1, 1, 1, 1)
    y = jnp.einsum("nchw,ow->ncho", conv, params["wfc"]) + params["bfc"]
    return jax.nn.sigmoid(y)


# ----------------------------------------------------------------------------- main


if __name__ == "__main__":
    key = jax.random.PRNGKey(0)
    kx, kp = jax.random.split(key)

    N, C, H, W = 2, 1, 16, 16
    Ho = H - KH + 1
    x = jax.random.normal(kx, (N, C, H, W), jnp.float32)
    params = init_params(kp, w_in=W - (KW - 1))   # LazyLinear infers in_features = W - 1 = 15

    ref = reference_forward(x, params)

    # Fused weights built once (hoisted out of the per-call path).
    a_bf16, b_eff = fuse_params(params, H, W, compute_dtype=jnp.bfloat16)   # default path
    a_f32, _ = fuse_params(params, H, W, compute_dtype=jnp.float32)

    # Default path: bf16 MXU operands, f32 accumulation, f32 output.
    out = jax.block_until_ready(neural_network_forward(x, a_bf16, b_eff))
    assert out.shape == (N, 1, Ho, FC_OUT), out.shape
    assert jnp.allclose(out, ref, atol=2e-2, rtol=2e-2), float(jnp.max(jnp.abs(out - ref)))

    # Full-f32 path: tight check of the fused-affine + kernel math.
    out32 = jax.block_until_ready(neural_network_forward(x, a_f32, b_eff))
    assert jnp.allclose(out32, ref, atol=1e-4, rtol=1e-4), float(jnp.max(jnp.abs(out32 - ref)))

    # bf16 output (largest remaining HBM-byte cut when downstream tolerates it).
    out_bf = jax.block_until_ready(
        neural_network_forward(x, a_bf16, b_eff, out_dtype=jnp.bfloat16))
    assert out_bf.dtype == jnp.bfloat16
    assert jnp.allclose(out_bf.astype(jnp.float32), ref, atol=2e-2, rtol=2e-2)

    # Odd batch: single full-array block, no host-side padding and no output slice.
    N2 = 11
    x2 = jax.random.normal(kx, (N2, C, H, W), jnp.float32)
    out2 = jax.block_until_ready(neural_network_forward(x2, a_f32, b_eff))
    assert out2.shape == (N2, 1, Ho, FC_OUT)
    assert jnp.allclose(out2, reference_forward(x2, params), atol=1e-4, rtol=1e-4)

    # Multi-block grid with a ragged boundary tile (Pallas drops the OOB rows).
    N3 = 20
    x3 = jax.random.normal(kx, (N3, C, H, W), jnp.float32)
    out3 = jax.block_until_ready(neural_network_forward(x3, a_f32, b_eff, b_tile=8))
    assert out3.shape == (N3, 1, Ho, FC_OUT)
    assert jnp.allclose(out3, reference_forward(x3, params), atol=1e-4, rtol=1e-4)

    print("KERNEL_OK")
</pallas_src>

<mosaic_0001>
module attributes {stable_mosaic.version = 11 : i64} {
  func.func @_fused_kernel(%arg0: i32, %arg1: memref<2x256xf32, #tpu.memory_space<vmem>>, %arg2: memref<256x300xbf16, #tpu.memory_space<vmem>>, %arg3: memref<1x300xf32, #tpu.memory_space<vmem>>, %arg4: memref<2x300xf32, #tpu.memory_space<vmem>>) attributes {dimension_semantics = [#tpu.dimension_semantics<parallel>], iteration_bounds = array<i64: 1>, scalar_prefetch = 0 : i64, scratch_operands = 0 : i64, tpu.core_type = #tpu.core_type<tc>, window_params = [{transform_indices = @transform_0, window_bounds = array<i64: 2, 256>}, {pipeline_mode = #tpu.pipeline_mode<synchronous>, transform_indices = @transform_1, window_bounds = array<i64: 256, 300>}, {pipeline_mode = #tpu.pipeline_mode<synchronous>, transform_indices = @transform_2, window_bounds = array<i64: 1, 300>}, {transform_indices = @transform_3, window_bounds = array<i64: 2, 300>}]} {
    %c0 = arith.constant 0 : index
    %c0_0 = arith.constant 0 : index
    %0 = vector.load %arg1[%c0, %c0_0] : memref<2x256xf32, #tpu.memory_space<vmem>>, vector<2x256xf32>
    %1 = arith.truncf %0 : vector<2x256xf32> to vector<2x256xbf16>
    %c0_1 = arith.constant 0 : index
    %c0_2 = arith.constant 0 : index
    %2 = vector.load %arg2[%c0_1, %c0_2] : memref<256x300xbf16, #tpu.memory_space<vmem>>, vector<256x300xbf16>
    %cst = arith.constant dense<0.000000e+00> : vector<2x300xf32>
    %3 = tpu.matmul %1, %2, %cst {dimension_numbers = #tpu.dot_dimension_numbers<[1], [0], [0], [1], [0, 0, 1, 1], [], []>} : vector<2x256xbf16>, vector<256x300xbf16>, vector<2x300xf32> -> vector<2x300xf32>
    %c0_3 = arith.constant 0 : index
    %c0_4 = arith.constant 0 : index
    %4 = vector.load %arg3[%c0_3, %c0_4] : memref<1x300xf32, #tpu.memory_space<vmem>>, vector<1x300xf32>
    %5 = vector.broadcast %4 : vector<1x300xf32> to vector<2x300xf32>
    %6 = arith.addf %3, %5 : vector<2x300xf32>
    %7 = arith.negf %6 : vector<2x300xf32>
    %8 = math.exp %7 : vector<2x300xf32>
    %cst_5 = arith.constant 1.000000e+00 : f32
    %9 = vector.broadcast %cst_5 : f32 to vector<2x300xf32>
    %10 = arith.addf %9, %8 : vector<2x300xf32>
    %11 = arith.divf %9, %10 : vector<2x300xf32>
    %c0_6 = arith.constant 0 : index
    %c0_7 = arith.constant 0 : index
    %12 = vector.load %arg4[%c0_6, %c0_7] : memref<2x300xf32, #tpu.memory_space<vmem>>, vector<2x300xf32>
    tpu.vector_store %arg4[%c0_6, %c0_7], %11 {strides = array<i32>} : memref<2x300xf32, #tpu.memory_space<vmem>>, vector<2x300xf32>,
    return
  }
  func.func @transform_0(%arg0: i32) -> (i32, i32) {
    %c0_i32 = arith.constant 0 : i32
    %c0_i32_0 = arith.constant 0 : i32
    return %arg0, %c0_i32 : i32, i32
  }
  func.func @transform_1(%arg0: i32) -> (i32, i32) {
    %c0_i32 = arith.constant 0 : i32
    %c0_i32_0 = arith.constant 0 : i32
    %c0_i32_1 = arith.constant 0 : i32
    return %c0_i32, %c0_i32_0 : i32, i32
  }
  func.func @transform_2(%arg0: i32) -> (i32, i32) {
    %c0_i32 = arith.constant 0 : i32
    %c0_i32_0 = arith.constant 0 : i32
    %c0_i32_1 = arith.constant 0 : i32
    return %c0_i32, %c0_i32_0 : i32, i32
  }
  func.func @transform_3(%arg0: i32) -> (i32, i32) {
    %c0_i32 = arith.constant 0 : i32
    %c0_i32_0 = arith.constant 0 : i32
    return %arg0, %c0_i32 : i32, i32
  }
}

</mosaic_0001>

<bundles_post_ra>
// kernel: neural_network_forward.1
= control target key start
LH: loop header
LB: loop body
LE: loop exit
PB: predicated region body
PF: predicated region fallthrough
CT: control target
= control target key end

     0   :  { %v95_v53 = vlaneseq  ;;  %vm485_vm0 = vcmask 1041408   ;;  %vm486_vm1 = vcmask 1043458   ;;  %vm488_vm3 = vcmask 357380   ;;  %s820_s1 = inlined_call_operand.vmem [shape: bf16[256,300], index: 1, kind: input, shape index: {}]   ;;  %s821_s0 = inlined_call_operand.vmem [shape: f32[2,256], index: 0, kind: input, shape index: {}]   ;;  %s822_s2 = inlined_call_operand.vmem [shape: f32[1,300], index: 2, kind: input, shape index: {}]   ;;  %s823_s3 = inlined_call_operand.vmem [shape: f32[2,300], index: 3, kind: output, shape index: {}]  }
   0x1   :  { %v570_v0 = vld [vmem:[%s820_s1 + $0xac] ss:$12 sps:$4 sm:$0xff]   ;;  %v572_v1 = vld [vmem:[%s820_s1 + $0xa8] ss:$12 sps:$4 sm:$0xff]   ;;  %v575_v3 = vld [vmem:[%s820_s1 + $0x90] ss:$12 sps:$4 sm:$0xff]  }
   0x2   :  { %366 = vmatprep.subr.bf16.mxu0 %v570_v0  ;;  %v573_v2 = vld [vmem:[%s820_s1 + $0x94] ss:$12 sps:$4 sm:$0xff]   ;;  %v576_v4 = vld [vmem:[%s820_s1 + $0x7c] ss:$12 sps:$4 sm:$0xff]   ;;  %v578_v5 = vld [vmem:[%s820_s1 + $0x78] ss:$12 sps:$4 sm:$0xff]  }
   0x3   :  { %367 = vmatpush1.bf16.msra.mxu0 %v572_v1  ;;  %v579_v6 = vld [vmem:[%s820_s1 + $0x64] ss:$12 sps:$4 sm:$0xff]   ;;  %v581_v7 = vld [vmem:[%s820_s1 + $0x60] ss:$12 sps:$4 sm:$0xff]   ;;  %v584_v13 = vld [vmem:[%s820_s1 + $0x48] ss:$12 sps:$4 sm:$0xff]  }
   0x4   :  { %368 = vmatprep.subr.bf16.mxu0 %v573_v2  ;;  %v591_v8 = vld [vmem:[%s820_s1 + $0x170] ss:$12 sps:$4 sm:$0xff]   ;;  %v582_v10 = vld [vmem:[%s820_s1 + $0x4c] ss:$12 sps:$4 sm:$0xff]   ;;  %v585_v14 = vld [vmem:[%s820_s1 + $0x34] ss:$12 sps:$4 sm:$0xff]  }
   0x5   :  { %v592_v9 = vld [vmem:[%s820_s1 + $0xb0] ss:$12 sps:$4 sm:$0xff]   ;;  %547 = vmatprep.subr.bf16.mxu1 %v591_v8  ;;  %v596_v11 = vld [vmem:[%s820_s1 + $0x158] ss:$12 sps:$4 sm:$0xff]   ;;  %v601_v15 = vld [vmem:[%s820_s1 + $0x140] ss:$12 sps:$4 sm:$0xff]  }
   0x6   :  { %548 = vmatpush3.bf16.msra.mxu1 %v592_v9  ;;  %v597_v12 = vld [vmem:[%s820_s1 + $0x98] ss:$12 sps:$4 sm:$0xff]   ;;  %v602_v16 = vld [vmem:[%s820_s1 + $0x80] ss:$12 sps:$4 sm:$0xff]   ;;  %v587_v17 = vld [vmem:[%s820_s1 + $0x30] ss:$12 sps:$4 sm:$0xff]  }
   0x7   :  { %369 = vmatpush1.bf16.msra.mxu0 %v575_v3  ;;  %549 = vmatprep.subr.bf16.mxu1 %v596_v11  ;;  %v588_v18 = vld [vmem:[%s820_s1 + $0x1c] ss:$12 sps:$4 sm:$0xff]   ;;  %v590_v21 = vld [vmem:[%s820_s1 + $0x18] ss:$12 sps:$4 sm:$0xff]   ;;  %v595_v26 = vld [vmem:[%s820_s1] ss:$12 sps:$4 sm:$0xff]  }
   0x8   :  { %370 = vmatprep.subr.bf16.mxu0 %v576_v4  ;;  %v606_v19 = vld [vmem:[%s820_s1 + $0x128] ss:$12 sps:$4 sm:$0xff]   ;;  %v611_v22 = vld [vmem:[%s820_s1 + $0x110] ss:$12 sps:$4 sm:$0xff]   ;;  %v616_v25 = vld [vmem:[%s820_s1 + $0xf8] ss:$12 sps:$4 sm:$0xff]  }
   0x9   :  { %v607_v20 = vld [vmem:[%s820_s1 + $0x68] ss:$12 sps:$4 sm:$0xff]   ;;  %v593_v23 = vld [vmem:[%s820_s1 + $0x4] ss:$12 sps:$4 sm:$0xff]   ;;  %v598_v27 = vld [vmem:[%s820_s1 + $0x16c] ss:$12 sps:$4 sm:$0xff]  }
   0xa   :  { %550 = vmatpush3.bf16.msra.mxu1 %v597_v12  ;;  %v612_v24 = vld [vmem:[%s820_s1 + $0x50] ss:$12 sps:$4 sm:$0xff]   ;;  %v617_v28 = vld [vmem:[%s820_s1 + $0x38] ss:$12 sps:$4 sm:$0xff]   ;;  %v621_v29 = vld [vmem:[%s820_s1 + $0xe0] ss:$12 sps:$4 sm:$0xff]  }
   0xb   :  { %371 = vmatpush1.bf16.msra.mxu0 %v578_v5  ;;  %551 = vmatprep.subr.bf16.mxu1 %v601_v15  ;;  %v600_v30 = vld [vmem:[%s820_s1 + $0x168] ss:$12 sps:$4 sm:$0xff]   ;;  %v622_v32 = vld [vmem:[%s820_s1 + $0x20] ss:$12 sps:$4 sm:$0xff]   ;;  %v605_v34 = vld [vmem:[%s820_s1 + $0x150] ss:$12 sps:$4 sm:$0xff]  }
   0xc   :  { %372 = vmatprep.subr.bf16.mxu0 %v579_v6  ;;  %v603_v31 = vld [vmem:[%s820_s1 + $0x154] ss:$12 sps:$4 sm:$0xff]   ;;  %v608_v35 = vld [vmem:[%s820_s1 + $0x13c] ss:$12 sps:$4 sm:$0xff]   ;;  %v610_v39 = vld [vmem:[%s820_s1 + $0x138] ss:$12 sps:$4 sm:$0xff]  }
   0xd   :  { %v626_v33 = vld [vmem:[%s820_s1 + $0xc8] ss:$12 sps:$4 sm:$0xff]   ;;  %v495_v36 = vld.sshfl [vmem:[%s821_s0] sm:$0x33 pattern:$0x76325410]  ;;  %vm487_vm2 = vmor %vm486_vm1, %vm485_vm0 }
   0xe   :  { %552 = vmatpush3.bf16.msra.mxu1 %v602_v16  ;;  %v627_v37 = vld [vmem:[%s820_s1 + $0x8] ss:$12 sps:$4 sm:$0xff]   ;;  %v24_v38 = vcombine.high %v495_v36, %v495_v36  ;;  %v613_v41 = vld [vmem:[%s820_s1 + $0x124] ss:$12 sps:$4 sm:$0xff]   ;;  %v27_v42 = vpack.c.bf16 %v495_v36, %v495_v36  ;;  %v615_v43 = vld [vmem:[%s820_s1 + $0x120] ss:$12 sps:$4 sm:$0xff]  }
   0xf   :  { %373 = vmatpush1.bf16.msra.mxu0 %v581_v7  ;;  %553 = vmatprep.subr.bf16.mxu1 %v606_v19  ;;  %v618_v44 = vld [vmem:[%s820_s1 + $0x10c] ss:$12 sps:$4 sm:$0xff]   ;;  %v620_v45 = vld [vmem:[%s820_s1 + $0x108] ss:$12 sps:$4 sm:$0xff]   ;;  %v625_v47 = vld [vmem:[%s820_s1 + $0xf0] ss:$12 sps:$4 sm:$0xff]  }
  0x10   :  { %374 = vmatprep.subr.bf16.mxu0 %v582_v10  ;;  %v28_v40 = vpack.c.bf16 %v24_v38, %v24_v38  ;;  %v623_v46 = vld [vmem:[%s820_s1 + $0xf4] ss:$12 sps:$4 sm:$0xff]   ;;  %v628_v48 = vld [vmem:[%s820_s1 + $0xdc] ss:$12 sps:$4 sm:$0xff]   ;;  %v630_v49 = vld [vmem:[%s820_s1 + $0xd8] ss:$12 sps:$4 sm:$0xff]  }
  0x11   :  { %v631_v50 = vld [vmem:[%s820_s1 + $0xc4] ss:$12 sps:$4 sm:$0xff]   ;;  %v633_v51 = vld [vmem:[%s820_s1 + $0xc0] ss:$12 sps:$4 sm:$0xff]   ;;  %v96_v56 = vshrl.u32 %v95_v53, 7  ;;  %vm489_vm4 = vmor %vm488_vm3, %vm487_vm2 }
  0x12   :  { %554 = vmatpush3.bf16.msra.mxu1 %v607_v20  ;;  %439 = vmatprep.mubr.bf16.mxu1 %v28_v40  ;;  %v93_v59 = vld [vmem:[%s822_s2] sm:$0x7] }
  0x13   :  { %375 = vmatpush1.bf16.msra.mxu0 %v584_v13  ;;  %555 = vmatprep.subr.bf16.mxu1 %v611_v22  ;;  %v105_v58 = vsub.s32 2, %v96_v56  ;;  %v97_v63 = vsub.s32 0, %v96_v56  ;;  %v101_v0 = vsub.s32 1, %v96_v56 }
  0x14   :  { %376 = vmatprep.subr.bf16.mxu0 %v585_v14  ;;  %398 = vmatprep.mubr.bf16.mxu0 %v28_v40 }
  0x15   :  { %v106_v60 = vrot.slane %v93_v59, %v105_v58  ;;  %v98_v2 = vrot.slane %v93_v59, %v97_v63  ;;  %v102_v3 = vrot.slane %v93_v59, %v101_v0 }
  0x16   :  { %556 = vmatpush3.bf16.msra.mxu1 %v612_v24 }
  0x17   :  { %377 = vmatpush1.bf16.msra.mxu0 %v587_v17  ;;  %557 = vmatprep.subr.bf16.mxu1 %v616_v25 }
  0x18   :  { %378 = vmatprep.subr.bf16.mxu0 %v588_v18  ;;  %v646_v18 = vmov 1983009808  }
  0x19   :  { %v470_v19 = vunpack.c.l.s4 %v646_v18 }
  0x1a   :  { %558 = vmatpush3.bf16.msra.mxu1 %v617_v28 }
  0x1b   :  { %379 = vmatpush1.bf16.msra.mxu0 %v590_v21  ;;  %559 = vmatprep.subr.bf16.mxu1 %v621_v29  ;;  %v471_v20 = vunpack.c.0.s8 %v470_v19 }
  0x1c   :  { %380 = vmatprep.subr.bf16.mxu0 %v593_v23 }
  0x1d   :  { %v474_v23 = vsub.s32 %v471_v20, %v96_v56 }
  0x1e   :  { %560 = vmatpush3.bf16.msra.mxu1 %v622_v32 }
  0x1f   :  { %381 = vmatpush1.bf16.msra.mxu0 %v595_v26  ;;  %561 = vmatprep.subr.bf16.mxu1 %v626_v33 }
  0x20   :  { %382 = vmatprep.subr.bf16.mxu0 %v598_v27 }
  0x22   :  { %562 = vmatpush3.bf16.msra.mxu1 %v627_v37 }
  0x23   :  { %383 = vmatpush2.bf16.msra.mxu0 %v600_v30 }
  0x24   :  { %384 = vmatprep.subr.bf16.mxu0 %v603_v31 }
  0x25   :  { %440 = vmatmul.mubr.bf16.vlgmr.msra.gmra.mxu1 %v27_v42 }
  0x27   :  { %385 = vmatpush2.bf16.msra.mxu0 %v605_v34 }
  0x28   :  { %386 = vmatprep.subr.bf16.mxu0 %v608_v35 }
  0x2b   :  { %387 = vmatpush2.bf16.msra.mxu0 %v610_v39 }
  0x2c   :  { %388 = vmatprep.subr.bf16.mxu0 %v613_v41 }
  0x2f   :  { %389 = vmatpush2.bf16.msra.mxu0 %v615_v43 }
  0x30   :  { %390 = vmatprep.subr.bf16.mxu0 %v618_v44 }
  0x33   :  { %391 = vmatpush2.bf16.msra.mxu0 %v620_v45 }
  0x34   :  { %392 = vmatprep.subr.bf16.mxu0 %v623_v46 }
  0x37   :  { %393 = vmatpush2.bf16.msra.mxu0 %v625_v47 }
  0x38   :  { %394 = vmatprep.subr.bf16.mxu0 %v628_v48 }
  0x3b   :  { %395 = vmatpush2.bf16.msra.mxu0 %v630_v49 }
  0x3c   :  { %396 = vmatprep.subr.bf16.mxu0 %v631_v50 }
  0x3f   :  { %397 = vmatpush2.bf16.msra.mxu0 %v633_v51 }
  0x42   :  { %399 = vmatmul.mubr.bf16.vlgmr.msra.gmra.mxu0 %v27_v42 }
  0xe5   :  { %v563_v52 = vpop.f32.mrf.mxu1 }
  0xe7   :  { %v564_v54 = vpop.f32.mrf.mxu1 }
  0xe8   :  { %v565_v61 = vadd.f32 %v564_v54, %v563_v52 }
  0xe9   :  { %v566_v55 = vpop.f32.mrf.mxu1 }
  0xea   :  { %v442_v62 = vadd.f32 %v565_v61, %v106_v60 }
  0xeb   :  { %v567_v57 = vpop.f32.mrf.mxu1 }
  0xec   :  { %v546_v1 = vmul.f32 -1.442695, %v442_v62 }
  0xee   :  { %634 = vpow2.f32 %v546_v1 }
  0xfb   :  { %v635_v12 = vpop.eup %634 }
  0xfc   :  { %v458_v13 = vadd.f32 1.0, %v635_v12 }
 0x102   :  { %v400_v4 = vpop.f32.mrf.mxu0 }
 0x103   :  { %v401_v5 = vadd.f32 %v400_v4, %v98_v2 }
 0x104   :  { %v402_v6 = vpop.f32.mrf.mxu0 }
 0x105   :  { %v544_v7 = vmul.f32 -1.442695, %v401_v5  ;;  %v403_v8 = vadd.f32 %v402_v6, %v102_v3 }
 0x106   :  { %v404_v9 = vpop.f32.mrf.mxu0 }
 0x107   :  { %636 = vpow2.f32 %v544_v7  ;;  %v545_v10 = vmul.f32 -1.442695, %v403_v8 }
 0x108   :  { %v405_v11 = vpop.f32.mrf.mxu0 }
 0x109   :  { %638 = vpow2.f32 %v545_v10 }
 0x10a   :  { %640 = vrcp.f32 %v458_v13 }
 0x114   :  { %v637_v14 = vpop.eup %636 }
 0x115   :  { %v456_v15 = vadd.f32 1.0, %v637_v14 }
 0x116   :  { %v639_v16 = vpop.eup %638 }
 0x117   :  { %v457_v17 = vadd.f32 1.0, %v639_v16  ;;  %642 = vrcp.f32 %v456_v15  ;;  %v641_v21 = vpop.eup %640 }
 0x118   :  { %v482_v26 = vrot.slane %v641_v21, %v474_v23 }
 0x119   :  { %644 = vrcp.f32 %v457_v17 }
 0x124   :  { %v643_v22 = vpop.eup %642 }
 0x126   :  { %v645_v24 = vpop.eup %644 }
 0x127   :  { %v468_v25 = vcombine.low %v643_v22, %v645_v24 }
 0x129   :  { %v475_v27 = vrot.slane %v468_v25, %v474_v23 }
 0x12b   :  { %v483_v28 = vcombine.low %v475_v27, %v482_v26 }
 0x12d   :  { %490 = vst.msk [vmem:[%s823_s3] sm:$0x3f] %vm489_vm4, %v483_v28 }

</bundles_post_ra>
